<compile_context>
chip_gen: v7x
topology: tpu7x:2x2x1
jax: 0.10.0
libtpu: 0.0.40
codegen_flags: <defaults>
</compile_context>

<pallas_src>
import functools

import jax
import jax.numpy as jnp
from jax.experimental import pallas as pl
from jax.experimental.pallas import tpu as pltpu


def _pair_indices(num_inputs):
    row, col = [], []
    for i in range(num_inputs - 1):
        for j in range(i + 1, num_inputs):
            row.append(i)
            col.append(j)
    return row, col


def _round_up(x, m):
    return ((x + m - 1) // m) * m


def _vec_kernel(x_ref, w_ref, o_ref, *, row, col):
    # x_ref: (N, E, TB), w_ref: (E, P), o_ref: (P, TB)
    for pr, (i, j) in enumerate(zip(row, col)):
        pi = x_ref[i].astype(jnp.float32)                  # (E, TB)
        qj = x_ref[j].astype(jnp.float32)                  # (E, TB)
        wpr = w_ref[:, pr:pr + 1].astype(jnp.float32)      # (E, 1)
        val = jnp.sum(pi * qj * wpr, axis=0, keepdims=True)  # (1, TB), f32 acc
        o_ref[pr:pr + 1, :] = val.astype(o_ref.dtype)      # lane-dense row store


def _mat_kernel(x_ref, k_ref, o_ref, *, row, col):
    # x_ref: (N, E, TB), k_ref: (P, E, E) with [pr, e2, e1], o_ref: (P, TB)
    for pr, (i, j) in enumerate(zip(row, col)):
        xi = x_ref[i].astype(jnp.float32)                  # (E, TB), indexed by e1
        xj = x_ref[j].astype(jnp.float32)                  # (E, TB), indexed by e2
        kpr = k_ref[pr].astype(jnp.float32)                # (E, E)  [e2, e1]
        # t[e2, b] = sum_e1 K[e2, pr, e1] * x[b, row[pr], e1]
        t = jnp.dot(kpr, xi,
                    preferred_element_type=jnp.float32,
                    precision=jax.lax.Precision.HIGHEST)   # (E, TB)
        val = jnp.sum(t * xj, axis=0, keepdims=True)       # (1, TB), f32 acc
        o_ref[pr:pr + 1, :] = val.astype(o_ref.dtype)


def outer_product_layer(embed_list, kernel, kernel_type="mat", block_b=512):
    """Pallas equivalent of OutterProductLayer.forward(embed_list)."""
    num_inputs = len(embed_list)
    row, col = _pair_indices(num_inputs)
    num_pairs = len(row)

    # Glue: stack the list of (B, 1, E) inputs into one (B, N, E) array, then
    # put the batch on the lane axis: (N, E, B_pad).
    x = jnp.concatenate(embed_list, axis=1)                # (B, N, E)
    B, N, E = x.shape
    out_dtype = x.dtype

    block_b = _round_up(max(block_b, 128), 128)
    tb = min(block_b, _round_up(B, 128))                   # multiple of 128
    b_pad = _round_up(B, tb)

    xt = jnp.transpose(x, (1, 2, 0))                       # (N, E, B)
    if b_pad != B:
        xt = jnp.pad(xt, ((0, 0), (0, 0), (0, b_pad - B)))

    if kernel_type == "mat":
        # (E, P, E) -> (P, E, E) so each pair's (E, E) matrix is a leading slab.
        k_arg = jnp.transpose(kernel, (1, 0, 2))
        kernel_fn = functools.partial(_mat_kernel, row=row, col=col)
        k_spec = pl.BlockSpec((num_pairs, E, E), lambda b: (0, 0, 0))
    elif kernel_type == "vec":
        k_arg = jnp.transpose(kernel)                      # (E, P)
        kernel_fn = functools.partial(_vec_kernel, row=row, col=col)
        k_spec = pl.BlockSpec((E, num_pairs), lambda b: (0, 0))
    elif kernel_type == "num":
        # (P, 1) -> broadcast to (E, P); sum_e p*q*k[pr] == k[pr]*sum_e p*q.
        k_arg = jnp.broadcast_to(jnp.transpose(kernel), (E, num_pairs))
        kernel_fn = functools.partial(_vec_kernel, row=row, col=col)
        k_spec = pl.BlockSpec((E, num_pairs), lambda b: (0, 0))
    else:
        raise ValueError(f"unknown kernel_type: {kernel_type}")

    out_t = pl.pallas_call(
        kernel_fn,
        out_shape=jax.ShapeDtypeStruct((num_pairs, b_pad), out_dtype),
        grid_spec=pltpu.PrefetchScalarGridSpec(
            num_scalar_prefetch=0,
            grid=(b_pad // tb,),
            in_specs=[
                pl.BlockSpec((N, E, tb), lambda b: (0, 0, b)),
                k_spec,
            ],
            out_specs=pl.BlockSpec((num_pairs, tb), lambda b: (0, b)),
        ),
        compiler_params=pltpu.CompilerParams(
            dimension_semantics=("parallel",),
            vmem_limit_bytes=32 * 1024 * 1024,
        ),
    )(xt, k_arg)

    return jnp.transpose(out_t)[:B, :]                     # (B, P)


def _reference(embed_list, kernel, kernel_type):
    # Pure-JAX port of the PyTorch forward, for verification.
    row, col = _pair_indices(len(embed_list))
    p = jnp.concatenate([embed_list[i] for i in row], axis=1)   # (B, P, E)
    q = jnp.concatenate([embed_list[j] for j in col], axis=1)   # (B, P, E)
    if kernel_type == "mat":
        p_ = p[:, None, :, :]                                    # (B, 1, P, E)
        kp = jnp.sum(
            jnp.transpose(jnp.sum(p_ * kernel[None], axis=-1), (0, 2, 1)) * q,
            axis=-1)
    else:
        k = kernel[None]                                         # (1,P,E)/(1,P,1)
        kp = jnp.sum(p * q * k, axis=-1)
    return kp


if __name__ == "__main__":
    B, N, E = 2, 4, 32          # batch=2, field_size=4, embedding_size=32
    P = N * (N - 1) // 2

    key = jax.random.PRNGKey(0)
    k_embed, k_mat, k_vec, k_num = jax.random.split(key, 4)
    embed_keys = jax.random.split(k_embed, N)
    embed_list = [jax.random.normal(k, (B, 1, E), dtype=jnp.float32)
                  for k in embed_keys]

    kern_mat = jax.random.uniform(k_mat, (E, P, E), jnp.float32, -0.1, 0.1)
    kern_vec = jax.random.uniform(k_vec, (P, E), jnp.float32, -0.1, 0.1)
    kern_num = jax.random.uniform(k_num, (P, 1), jnp.float32, -0.1, 0.1)

    for ktype, kern in (("mat", kern_mat), ("vec", kern_vec), ("num", kern_num)):
        out = jax.block_until_ready(
            outer_product_layer(embed_list, kern, kernel_type=ktype))
        ref = _reference(embed_list, kern, ktype)
        assert out.shape == (B, P), (ktype, out.shape)
        assert jnp.allclose(out, ref, atol=1e-3, rtol=1e-3), (
            ktype, float(jnp.max(jnp.abs(out - ref))))

    print("KERNEL_OK")
</pallas_src>

<mosaic_0001>
module attributes {stable_mosaic.version = 11 : i64} {
  func.func @_mat_kernel(%arg0: i32, %arg1: memref<4x32x128xf32, #tpu.memory_space<vmem>>, %arg2: memref<6x32x32xf32, #tpu.memory_space<vmem>>, %arg3: memref<6x128xf32, #tpu.memory_space<vmem>>) attributes {dimension_semantics = [#tpu.dimension_semantics<parallel>], iteration_bounds = array<i64: 1>, scalar_prefetch = 0 : i64, scratch_operands = 0 : i64, tpu.core_type = #tpu.core_type<tc>, window_params = [{transform_indices = @transform_0, window_bounds = array<i64: 4, 32, 128>}, {pipeline_mode = #tpu.pipeline_mode<synchronous>, transform_indices = @transform_1, window_bounds = array<i64: 6, 32, 32>}, {transform_indices = @transform_2, window_bounds = array<i64: 6, 128>}]} {
    %c0 = arith.constant 0 : index
    %c0_0 = arith.constant 0 : index
    %c0_1 = arith.constant 0 : index
    %0 = vector.load %arg1[%c0, %c0_0, %c0_1] : memref<4x32x128xf32, #tpu.memory_space<vmem>>, vector<1x32x128xf32>
    %1 = vector.shape_cast %0 : vector<1x32x128xf32> to vector<32x128xf32>
    %c1 = arith.constant 1 : index
    %c0_2 = arith.constant 0 : index
    %c0_3 = arith.constant 0 : index
    %2 = vector.load %arg1[%c1, %c0_2, %c0_3] : memref<4x32x128xf32, #tpu.memory_space<vmem>>, vector<1x32x128xf32>
    %3 = vector.shape_cast %2 : vector<1x32x128xf32> to vector<32x128xf32>
    %c0_4 = arith.constant 0 : index
    %c0_5 = arith.constant 0 : index
    %c0_6 = arith.constant 0 : index
    %4 = vector.load %arg2[%c0_4, %c0_5, %c0_6] : memref<6x32x32xf32, #tpu.memory_space<vmem>>, vector<1x32x32xf32>
    %5 = vector.shape_cast %4 : vector<1x32x32xf32> to vector<32x32xf32>
    %cst = arith.constant dense<0.000000e+00> : vector<32x128xf32>
    %6 = tpu.matmul %5, %1, %cst {dimension_numbers = #tpu.dot_dimension_numbers<[1], [0], [0], [1], [0, 0, 1, 1], [], []>, precision = #tpu.contract_precision<fp32>} : vector<32x32xf32>, vector<32x128xf32>, vector<32x128xf32> -> vector<32x128xf32>
    %7 = arith.mulf %6, %3 : vector<32x128xf32>
    %cst_7 = arith.constant dense<0.000000e+00> : vector<128xf32>
    %8 = vector.multi_reduction <add>, %7, %cst_7 [0] : vector<32x128xf32> to vector<128xf32>
    %9 = vector.shape_cast %8 : vector<128xf32> to vector<1x128xf32>
    %c0_8 = arith.constant 0 : index
    %c0_9 = arith.constant 0 : index
    %10 = vector.load %arg3[%c0_8, %c0_9] : memref<6x128xf32, #tpu.memory_space<vmem>>, vector<1x128xf32>
    tpu.vector_store %arg3[%c0_8, %c0_9], %9 {strides = array<i32>} : memref<6x128xf32, #tpu.memory_space<vmem>>, vector<1x128xf32>,
    %c0_10 = arith.constant 0 : index
    %c0_11 = arith.constant 0 : index
    %c0_12 = arith.constant 0 : index
    %11 = vector.load %arg1[%c0_10, %c0_11, %c0_12] : memref<4x32x128xf32, #tpu.memory_space<vmem>>, vector<1x32x128xf32>
    %12 = vector.shape_cast %11 : vector<1x32x128xf32> to vector<32x128xf32>
    %c2 = arith.constant 2 : index
    %c0_13 = arith.constant 0 : index
    %c0_14 = arith.constant 0 : index
    %13 = vector.load %arg1[%c2, %c0_13, %c0_14] : memref<4x32x128xf32, #tpu.memory_space<vmem>>, vector<1x32x128xf32>
    %14 = vector.shape_cast %13 : vector<1x32x128xf32> to vector<32x128xf32>
    %c1_15 = arith.constant 1 : index
    %c0_16 = arith.constant 0 : index
    %c0_17 = arith.constant 0 : index
    %15 = vector.load %arg2[%c1_15, %c0_16, %c0_17] : memref<6x32x32xf32, #tpu.memory_space<vmem>>, vector<1x32x32xf32>
    %16 = vector.shape_cast %15 : vector<1x32x32xf32> to vector<32x32xf32>
    %cst_18 = arith.constant dense<0.000000e+00> : vector<32x128xf32>
    %17 = tpu.matmul %16, %12, %cst_18 {dimension_numbers = #tpu.dot_dimension_numbers<[1], [0], [0], [1], [0, 0, 1, 1], [], []>, precision = #tpu.contract_precision<fp32>} : vector<32x32xf32>, vector<32x128xf32>, vector<32x128xf32> -> vector<32x128xf32>
    %18 = arith.mulf %17, %14 : vector<32x128xf32>
    %cst_19 = arith.constant dense<0.000000e+00> : vector<128xf32>
    %19 = vector.multi_reduction <add>, %18, %cst_19 [0] : vector<32x128xf32> to vector<128xf32>
    %20 = vector.shape_cast %19 : vector<128xf32> to vector<1x128xf32>
    %c1_20 = arith.constant 1 : index
    %c0_21 = arith.constant 0 : index
    %21 = vector.load %arg3[%c1_20, %c0_21] : memref<6x128xf32, #tpu.memory_space<vmem>>, vector<1x128xf32>
    tpu.vector_store %arg3[%c1_20, %c0_21], %20 {strides = array<i32>} : memref<6x128xf32, #tpu.memory_space<vmem>>, vector<1x128xf32>,
    %c0_22 = arith.constant 0 : index
    %c0_23 = arith.constant 0 : index
    %c0_24 = arith.constant 0 : index
    %22 = vector.load %arg1[%c0_22, %c0_23, %c0_24] : memref<4x32x128xf32, #tpu.memory_space<vmem>>, vector<1x32x128xf32>
    %23 = vector.shape_cast %22 : vector<1x32x128xf32> to vector<32x128xf32>
    %c3 = arith.constant 3 : index
    %c0_25 = arith.constant 0 : index
    %c0_26 = arith.constant 0 : index
    %24 = vector.load %arg1[%c3, %c0_25, %c0_26] : memref<4x32x128xf32, #tpu.memory_space<vmem>>, vector<1x32x128xf32>
    %25 = vector.shape_cast %24 : vector<1x32x128xf32> to vector<32x128xf32>
    %c2_27 = arith.constant 2 : index
    %c0_28 = arith.constant 0 : index
    %c0_29 = arith.constant 0 : index
    %26 = vector.load %arg2[%c2_27, %c0_28, %c0_29] : memref<6x32x32xf32, #tpu.memory_space<vmem>>, vector<1x32x32xf32>
    %27 = vector.shape_cast %26 : vector<1x32x32xf32> to vector<32x32xf32>
    %cst_30 = arith.constant dense<0.000000e+00> : vector<32x128xf32>
    %28 = tpu.matmul %27, %23, %cst_30 {dimension_numbers = #tpu.dot_dimension_numbers<[1], [0], [0], [1], [0, 0, 1, 1], [], []>, precision = #tpu.contract_precision<fp32>} : vector<32x32xf32>, vector<32x128xf32>, vector<32x128xf32> -> vector<32x128xf32>
    %29 = arith.mulf %28, %25 : vector<32x128xf32>
    %cst_31 = arith.constant dense<0.000000e+00> : vector<128xf32>
    %30 = vector.multi_reduction <add>, %29, %cst_31 [0] : vector<32x128xf32> to vector<128xf32>
    %31 = vector.shape_cast %30 : vector<128xf32> to vector<1x128xf32>
    %c2_32 = arith.constant 2 : index
    %c0_33 = arith.constant 0 : index
    %32 = vector.load %arg3[%c2_32, %c0_33] : memref<6x128xf32, #tpu.memory_space<vmem>>, vector<1x128xf32>
    tpu.vector_store %arg3[%c2_32, %c0_33], %31 {strides = array<i32>} : memref<6x128xf32, #tpu.memory_space<vmem>>, vector<1x128xf32>,
    %c1_34 = arith.constant 1 : index
    %c0_35 = arith.constant 0 : index
    %c0_36 = arith.constant 0 : index
    %33 = vector.load %arg1[%c1_34, %c0_35, %c0_36] : memref<4x32x128xf32, #tpu.memory_space<vmem>>, vector<1x32x128xf32>
    %34 = vector.shape_cast %33 : vector<1x32x128xf32> to vector<32x128xf32>
    %c2_37 = arith.constant 2 : index
    %c0_38 = arith.constant 0 : index
    %c0_39 = arith.constant 0 : index
    %35 = vector.load %arg1[%c2_37, %c0_38, %c0_39] : memref<4x32x128xf32, #tpu.memory_space<vmem>>, vector<1x32x128xf32>
    %36 = vector.shape_cast %35 : vector<1x32x128xf32> to vector<32x128xf32>
    %c3_40 = arith.constant 3 : index
    %c0_41 = arith.constant 0 : index
    %c0_42 = arith.constant 0 : index
    %37 = vector.load %arg2[%c3_40, %c0_41, %c0_42] : memref<6x32x32xf32, #tpu.memory_space<vmem>>, vector<1x32x32xf32>
    %38 = vector.shape_cast %37 : vector<1x32x32xf32> to vector<32x32xf32>
    %cst_43 = arith.constant dense<0.000000e+00> : vector<32x128xf32>
    %39 = tpu.matmul %38, %34, %cst_43 {dimension_numbers = #tpu.dot_dimension_numbers<[1], [0], [0], [1], [0, 0, 1, 1], [], []>, precision = #tpu.contract_precision<fp32>} : vector<32x32xf32>, vector<32x128xf32>, vector<32x128xf32> -> vector<32x128xf32>
    %40 = arith.mulf %39, %36 : vector<32x128xf32>
    %cst_44 = arith.constant dense<0.000000e+00> : vector<128xf32>
    %41 = vector.multi_reduction <add>, %40, %cst_44 [0] : vector<32x128xf32> to vector<128xf32>
    %42 = vector.shape_cast %41 : vector<128xf32> to vector<1x128xf32>
    %c3_45 = arith.constant 3 : index
    %c0_46 = arith.constant 0 : index
    %43 = vector.load %arg3[%c3_45, %c0_46] : memref<6x128xf32, #tpu.memory_space<vmem>>, vector<1x128xf32>
    tpu.vector_store %arg3[%c3_45, %c0_46], %42 {strides = array<i32>} : memref<6x128xf32, #tpu.memory_space<vmem>>, vector<1x128xf32>,
    %c1_47 = arith.constant 1 : index
    %c0_48 = arith.constant 0 : index
    %c0_49 = arith.constant 0 : index
    %44 = vector.load %arg1[%c1_47, %c0_48, %c0_49] : memref<4x32x128xf32, #tpu.memory_space<vmem>>, vector<1x32x128xf32>
    %45 = vector.shape_cast %44 : vector<1x32x128xf32> to vector<32x128xf32>
    %c3_50 = arith.constant 3 : index
    %c0_51 = arith.constant 0 : index
    %c0_52 = arith.constant 0 : index
    %46 = vector.load %arg1[%c3_50, %c0_51, %c0_52] : memref<4x32x128xf32, #tpu.memory_space<vmem>>, vector<1x32x128xf32>
    %47 = vector.shape_cast %46 : vector<1x32x128xf32> to vector<32x128xf32>
    %c4 = arith.constant 4 : index
    %c0_53 = arith.constant 0 : index
    %c0_54 = arith.constant 0 : index
    %48 = vector.load %arg2[%c4, %c0_53, %c0_54] : memref<6x32x32xf32, #tpu.memory_space<vmem>>, vector<1x32x32xf32>
    %49 = vector.shape_cast %48 : vector<1x32x32xf32> to vector<32x32xf32>
    %cst_55 = arith.constant dense<0.000000e+00> : vector<32x128xf32>
    %50 = tpu.matmul %49, %45, %cst_55 {dimension_numbers = #tpu.dot_dimension_numbers<[1], [0], [0], [1], [0, 0, 1, 1], [], []>, precision = #tpu.contract_precision<fp32>} : vector<32x32xf32>, vector<32x128xf32>, vector<32x128xf32> -> vector<32x128xf32>
    %51 = arith.mulf %50, %47 : vector<32x128xf32>
    %cst_56 = arith.constant dense<0.000000e+00> : vector<128xf32>
    %52 = vector.multi_reduction <add>, %51, %cst_56 [0] : vector<32x128xf32> to vector<128xf32>
    %53 = vector.shape_cast %52 : vector<128xf32> to vector<1x128xf32>
    %c4_57 = arith.constant 4 : index
    %c0_58 = arith.constant 0 : index
    %54 = vector.load %arg3[%c4_57, %c0_58] : memref<6x128xf32, #tpu.memory_space<vmem>>, vector<1x128xf32>
    tpu.vector_store %arg3[%c4_57, %c0_58], %53 {strides = array<i32>} : memref<6x128xf32, #tpu.memory_space<vmem>>, vector<1x128xf32>,
    %c2_59 = arith.constant 2 : index
    %c0_60 = arith.constant 0 : index
    %c0_61 = arith.constant 0 : index
    %55 = vector.load %arg1[%c2_59, %c0_60, %c0_61] : memref<4x32x128xf32, #tpu.memory_space<vmem>>, vector<1x32x128xf32>
    %56 = vector.shape_cast %55 : vector<1x32x128xf32> to vector<32x128xf32>
    %c3_62 = arith.constant 3 : index
    %c0_63 = arith.constant 0 : index
    %c0_64 = arith.constant 0 : index
    %57 = vector.load %arg1[%c3_62, %c0_63, %c0_64] : memref<4x32x128xf32, #tpu.memory_space<vmem>>, vector<1x32x128xf32>
    %58 = vector.shape_cast %57 : vector<1x32x128xf32> to vector<32x128xf32>
    %c5 = arith.constant 5 : index
    %c0_65 = arith.constant 0 : index
    %c0_66 = arith.constant 0 : index
    %59 = vector.load %arg2[%c5, %c0_65, %c0_66] : memref<6x32x32xf32, #tpu.memory_space<vmem>>, vector<1x32x32xf32>
    %60 = vector.shape_cast %59 : vector<1x32x32xf32> to vector<32x32xf32>
    %cst_67 = arith.constant dense<0.000000e+00> : vector<32x128xf32>
    %61 = tpu.matmul %60, %56, %cst_67 {dimension_numbers = #tpu.dot_dimension_numbers<[1], [0], [0], [1], [0, 0, 1, 1], [], []>, precision = #tpu.contract_precision<fp32>} : vector<32x32xf32>, vector<32x128xf32>, vector<32x128xf32> -> vector<32x128xf32>
    %62 = arith.mulf %61, %58 : vector<32x128xf32>
    %cst_68 = arith.constant dense<0.000000e+00> : vector<128xf32>
    %63 = vector.multi_reduction <add>, %62, %cst_68 [0] : vector<32x128xf32> to vector<128xf32>
    %64 = vector.shape_cast %63 : vector<128xf32> to vector<1x128xf32>
    %c5_69 = arith.constant 5 : index
    %c0_70 = arith.constant 0 : index
    %65 = vector.load %arg3[%c5_69, %c0_70] : memref<6x128xf32, #tpu.memory_space<vmem>>, vector<1x128xf32>
    tpu.vector_store %arg3[%c5_69, %c0_70], %64 {strides = array<i32>} : memref<6x128xf32, #tpu.memory_space<vmem>>, vector<1x128xf32>,
    return
  }
  func.func @transform_0(%arg0: i32) -> (i32, i32, i32) {
    %c0_i32 = arith.constant 0 : i32
    %c0_i32_0 = arith.constant 0 : i32
    %c0_i32_1 = arith.constant 0 : i32
    return %c0_i32, %c0_i32_0, %arg0 : i32, i32, i32
  }
  func.func @transform_1(%arg0: i32) -> (i32, i32, i32) {
    %c0_i32 = arith.constant 0 : i32
    %c0_i32_0 = arith.constant 0 : i32
    %c0_i32_1 = arith.constant 0 : i32
    %c0_i32_2 = arith.constant 0 : i32
    return %c0_i32, %c0_i32_0, %c0_i32_1 : i32, i32, i32
  }
  func.func @transform_2(%arg0: i32) -> (i32, i32) {
    %c0_i32 = arith.constant 0 : i32
    %c0_i32_0 = arith.constant 0 : i32
    return %c0_i32, %arg0 : i32, i32
  }
}

</mosaic_0001>

<bundles_post_ra>
// kernel: tpu_custom_call.1
= control target key start
LH: loop header
LB: loop body
LE: loop exit
PB: predicated region body
PF: predicated region fallthrough
CT: control target
= control target key end

     0   :  { %7 = vsyncpa [#allocation3], 0  ;;  %s6030_s0 = inlined_call_operand.hbm [shape: f32[4,32,128], index: 0, kind: input, shape index: {}]   ;;  %s6031_s1 = inlined_call_operand.hbm [shape: f32[6,32,32], index: 1, kind: input, shape index: {}]   ;;  %s6032_s2 = inlined_call_operand.hbm [shape: f32[6,128], index: 2, kind: output, shape index: {}]  }
   0x1   :  { %8 = vsyncpa [#allocation6], 0 }
   0x2   :  { %9 = vsyncpa [#allocation4], 0  ;;  %s5254_s9 = smov [#allocation2]   ;;  %s5182_s13 = scalar_lea.hbm %s6030_s0, 2048 }
   0x3   :  { %s15_s10 = sshll.u32 %s5254_s9, 4  ;;  %p5183_p0 = scmp.ne.s32.totalorder %s6030_s0, %s5182_s13  ;;  %s16_s10 = int_to_ptr.vmem [resolvable:$true] %s15_s10 }
   0x4   :  { %p5186_p1 = scmp.lt.u32.totalorder %s5182_s13, %s6030_s0 }
   0x6   :  { %p5188_p2 = pnand %p5186_p1, %p5183_p0 }
   0x8   :  { %5191 = shalt.err (!%p5188_p2)
}
   0x9   :  { %s5192_s18 = scalar_lea.vmem %s16_s10, 2048  ;;  %p5197_p4 = scmp.lt.s32.totalorder %s16_s10, %s16_s10 }
   0xa   :  { %p5193_p3 = scmp.ne.s32.totalorder %s16_s10, %s5192_s18  ;;  %p5198_p5 = scmp.lt.s32.totalorder %s5192_s18, %s5192_s18 }
   0xc   :  { %p5199_p6 = por %p5198_p5, %p5197_p4 }
   0xe   :  { %p5200_p7 = pnand %p5199_p6, %p5193_p3 }
  0x10   :  { %5203 = shalt.err (!%p5200_p7)
}
  0x11   :  { %s5255_s19 = smov 128   ;;  %s5256_s20 = smov 8  }
  0x12   :  { %21 = dma.hbm_to_vmem [thread:$0]  %s6030_s0, 2048, %s16_s10, [#allocation3], %s5255_s19, %s5255_s19, %s5256_s20  }
  0x13   :  { %s5257_s23 = smov [#allocation5]   ;;  %s5204_s27 = scalar_lea.hbm %s6031_s1, 3072 }
  0x14   :  { %s27_s24 = sshll.u32 %s5257_s23, 4  ;;  %p5205_p8 = scmp.ne.s32.totalorder %s6031_s1, %s5204_s27  ;;  %s28_s24 = int_to_ptr.vmem [resolvable:$true] %s27_s24 }
  0x15   :  { %p5208_p9 = scmp.lt.u32.totalorder %s5204_s27, %s6031_s1 }
  0x17   :  { %p5210_p10 = pnand %p5208_p9, %p5205_p8 }
  0x19   :  { %5213 = shalt.err (!%p5210_p10)
}
  0x1a   :  { %s5214_s4 = scalar_lea.vmem %s28_s24, 3072  ;;  %p5219_p12 = scmp.lt.s32.totalorder %s28_s24, %s28_s24 }
  0x1b   :  { %p5215_p11 = scmp.ne.s32.totalorder %s28_s24, %s5214_s4  ;;  %p5220_p13 = scmp.lt.s32.totalorder %s5214_s4, %s5214_s4 }
  0x1d   :  { %p5221_p0 = por %p5220_p13, %p5219_p12 }
  0x1f   :  { %p5222_p1 = pnand %p5221_p0, %p5215_p11 }
  0x21   :  { %5225 = shalt.err (!%p5222_p1)
}
  0x22   :  { %33 = dma.hbm_to_vmem [thread:$0]  %s6031_s1, 3072, %s28_s24, [#allocation6], %s5255_s19, %s5255_s19, %s5256_s20  }
  0x23   :  { %5248 = dma.done.wait [#allocation3], 2048  }
  0x24   :  { %5249 = vsyncadd [#allocation3], 4294965248 }
  0x25   :  { %5250 = dma.done.wait [#allocation6], 3072  }
  0x26   :  { %5251 = vsyncadd [#allocation6], 4294964224  ;;  %vm53_vm0 = vcmask 261120   ;;  %v40_v0 = vld [vmem:[#allocation2] sm:$0xff]  ;;  %v41_v1 = vld [vmem:[#allocation2 + $0x8] sm:$0xff]  ;;  %s5258_s1 = smov [#allocation7]  }
  0x27   :  { %v5298_v2 = vld [vmem:[#allocation2 + $0x10] sm:$0xff]  ;;  %v67_v3 = vand.u32 4294901760, %v40_v0  ;;  %v70_v4 = vand.u32 4294901760, %v41_v1  ;;  %v5300_v5 = vld [vmem:[#allocation2 + $0x18] sm:$0xff]  ;;  %v49_v7 = vld [vmem:[#allocation5] sm:$0xff]  ;;  %s3967_s6 = sshll.u32 %s5258_s1, 4  ;;  %s3968_s6 = int_to_ptr.vmem [resolvable:$true] %s3967_s6 }
  0x28   :  { %v73_v6 = vand.u32 4294901760, %v5298_v2  ;;  %v704_v8 = vld [vmem:[#allocation5 + $0x20] sm:$0xff]  ;;  %v76_v9 = vand.u32 4294901760, %v5300_v5  ;;  %v55_v10 = vsel %vm53_vm0, %v49_v7, 0  ;;  %v50_v12 = vld [vmem:[#allocation5 + $0x8] sm:$0xff]  ;;  %v51_v14 = vld [vmem:[#allocation5 + $0x10] sm:$0xff]  ;;  %p5231_p3 = scmp.lt.s32.totalorder %s3968_s6, %s3968_s6 }
  0x29   :  { %v709_v11 = vsel %vm53_vm0, %v704_v8, 0  ;;  %v705_v13 = vld [vmem:[#allocation5 + $0x28] sm:$0xff]  ;;  %v5306_v15 = vpack.c.bf16 %v70_v4, %v67_v3  ;;  %v5308_v16 = vand.u32 4294901760, %v55_v10  ;;  %v58_v18 = vsel %vm53_vm0, %v50_v12, 0  ;;  %v706_v23 = vld [vmem:[#allocation5 + $0x30] sm:$0xff]  ;;  %v52_v44 = vld [vmem:[#allocation5 + $0x18] sm:$0xff] }
  0x2a   :  { %v5310_v17 = vand.u32 4294901760, %v709_v11  ;;  %v5317_v19 = vpack.c.bf16 %v76_v9, %v73_v6  ;;  %v5319_v20 = vand.u32 4294901760, %v58_v18  ;;  %v5321_v21 = vsub.f32 %v40_v0, %v67_v3  ;;  %v707_v53 = vld [vmem:[#allocation5 + $0x38] sm:$0xff]  ;;  %s5226_s7 = scalar_lea.vmem %s3968_s6, 128 }
  0x2b   :  { %v5323_v22 = vsub.f32 %v41_v1, %v70_v4  ;;  %4770 = vmatprep.subr.bf16.mxu0 %v5306_v15  ;;  %4818 = vmatprep.subr.bf16.mxu1 %v5306_v15  ;;  %v5328_v24 = vsub.f32 %v55_v10, %v5308_v16  ;;  %v712_v26 = vsel %vm53_vm0, %v705_v13, 0  ;;  %v61_v27 = vsel %vm53_vm0, %v51_v14, 0  ;;  %p5227_p2 = scmp.ne.s32.totalorder %s3968_s6, %s5226_s7  ;;  %p5232_p4 = scmp.lt.s32.totalorder %s5226_s7, %s5226_s7 }
  0x2c   :  { %v5331_v25 = vsub.f32 %v709_v11, %v5310_v17  ;;  %4772 = vmatpush3.bf16.msra.mxu0 %v5306_v15  ;;  %4820 = vmatpush3.bf16.msra.mxu1 %v5306_v15  ;;  %v5338_v28 = vsub.f32 %v58_v18, %v5319_v20  ;;  %v178_v29 = vand.u32 4294901760, %v5321_v21  ;;  %v5342_v31 = vand.u32 4294901760, %v712_v26 }
  0x2d   :  { %v185_v30 = vand.u32 4294901760, %v5323_v22  ;;  %4774 = vmatprep.subr.bf16.mxu0 %v5317_v19  ;;  %4822 = vmatprep.subr.bf16.mxu1 %v5317_v19  ;;  %v137_v32 = vand.u32 4294901760, %v5328_v24  ;;  %v5348_v34 = vand.u32 4294901760, %v61_v27  ;;  %v715_v35 = vsel %vm53_vm0, %v706_v23, 0  ;;  %p5233_p5 = por %p5232_p4, %p5231_p3 }
  0x2e   :  { %v791_v33 = vand.u32 4294901760, %v5331_v25  ;;  %v147_v36 = vand.u32 4294901760, %v5338_v28  ;;  %v179_v37 = vsub.f32 %v5321_v21, %v178_v29  ;;  %v5359_v39 = vsub.f32 %v712_v26, %v5342_v31 }
  0x2f   :  { %v186_v38 = vsub.f32 %v5323_v22, %v185_v30  ;;  %v138_v40 = vsub.f32 %v5328_v24, %v137_v32  ;;  %v5368_v42 = vsub.f32 %v61_v27, %v5348_v34  ;;  %v5370_v43 = vand.u32 4294901760, %v715_v35  ;;  %p5234_p6 = pnand %p5233_p5, %p5227_p2 }
  0x30   :  { %v792_v41 = vsub.f32 %v5331_v25, %v791_v33  ;;  %4776 = vmatpush3.bf16.msra.mxu0 %v5317_v19  ;;  %4824 = vmatpush3.bf16.msra.mxu1 %v5317_v19  ;;  %v148_v45 = vsub.f32 %v5338_v28, %v147_v36  ;;  %v180_v46 = vand.u32 4294901760, %v179_v37  ;;  %v801_v48 = vand.u32 4294901760, %v5359_v39 }
  0x31   :  { %v187_v47 = vand.u32 4294901760, %v186_v38  ;;  %v139_v49 = vand.u32 4294901760, %v138_v40  ;;  %v157_v51 = vand.u32 4294901760, %v5368_v42  ;;  %v5380_v52 = vsub.f32 %v715_v35, %v5370_v43 }
  0x32   :  { %v793_v50 = vand.u32 4294901760, %v792_v41  ;;  %v149_v54 = vand.u32 4294901760, %v148_v45  ;;  %v802_v56 = vsub.f32 %v5359_v39, %v801_v48  ;;  %v64_v57 = vsel %vm53_vm0, %v52_v44, 0  ;;  %v1358_v41 = vld [vmem:[#allocation5 + $0x40] sm:$0xff] }
  0x33   :  { %v5382_v55 = vpack.c.bf16 %v187_v47, %v180_v46  ;;  %4273 = vmatprep.mubr.f32.mxu0 %v139_v49  ;;  %v158_v58 = vsub.f32 %v5368_v42, %v157_v51  ;;  %v811_v59 = vand.u32 4294901760, %v5380_v52  ;;  %v5392_v60 = vand.u32 4294901760, %v64_v57  ;;  %v5485_v44 = vld [vmem:[#allocation2 + $0x20] sm:$0xff]  ;;  %v1360_v46 = vld [vmem:[#allocation5 + $0x50] sm:$0xff] }
  0x34   :  { %4357 = vmatprep.mubr.f32.mxu1 %v793_v50  ;;  %v5397_v61 = vsub.f32 %v5298_v2, %v73_v6  ;;  %4274 = vmatmul.mubr.f32.vlgmr.msra.gmra.mrb[0].mxu0 %v149_v54  ;;  %v803_v62 = vand.u32 4294901760, %v802_v56  ;;  %v5403_v63 = vsub.f32 %v5300_v5, %v76_v9  ;;  %v718_v0 = vsel %vm53_vm0, %v707_v53, 0  ;;  %v2011_v45 = vld [vmem:[#allocation5 + $0x60] sm:$0xff]  ;;  %v2012_v50 = vld [vmem:[#allocation5 + $0x68] sm:$0xff]  ;;  %v1361_v56 = vld [vmem:[#allocation5 + $0x58] sm:$0xff] }
  0x35   :  { %4778 = vmatprep.subr.bf16.mxu0 %v5382_v55  ;;  %4826 = vmatprep.subr.bf16.mxu1 %v5382_v55  ;;  %v159_v1 = vand.u32 4294901760, %v158_v58  ;;  %v812_v2 = vsub.f32 %v5380_v52, %v811_v59  ;;  %v5412_v3 = vsub.f32 %v64_v57, %v5392_v60  ;;  %v5416_v6 = vand.u32 4294901760, %v718_v0 }
  0x36   :  { %4780 = vmatpush3.bf16.msra.mxu0 %v5382_v55  ;;  %v192_v4 = vand.u32 4294901760, %v5397_v61  ;;  %4358 = vmatmul.mubr.f32.vlgmr.msra.gmra.mrb[0].mxu1 %v803_v62  ;;  %v199_v5 = vand.u32 4294901760, %v5403_v63  ;;  %v5440_v35 = vpack.c.bf16 %v5323_v22, %v5321_v21  ;;  %v5449_v38 = vpack.c.bf16 %v5403_v63, %v5397_v61  ;;  %v5490_v21 = vld [vmem:[#allocation2 + $0x28] sm:$0xff] }
  0x37   :  { %4828 = vmatpush3.bf16.msra.mxu1 %v5382_v55  ;;  %4276 = vmatprep.mubr.f32.mxu0 %v159_v1  ;;  %v813_v7 = vand.u32 4294901760, %v812_v2  ;;  %v167_v8 = vand.u32 4294901760, %v5412_v3  ;;  %v5427_v11 = vsub.f32 %v718_v0, %v5416_v6  ;;  %v5479_v40 = vpack.c.bf16 %v185_v30, %v178_v29  ;;  %v1359_v22 = vld [vmem:[#allocation5 + $0x48] sm:$0xff] }
  0x38   :  { %v193_v9 = vsub.f32 %v5397_v61, %v192_v4  ;;  %v200_v10 = vsub.f32 %v5403_v63, %v199_v5  ;;  %v5498_v29 = vpack.c.bf16 %v199_v5, %v192_v4  ;;  %v1363_v30 = vsel %vm53_vm0, %v1358_v41, 0 }
  0x39   :  { %4360 = vmatprep.mubr.f32.mxu1 %v813_v7  ;;  %v168_v12 = vsub.f32 %v5412_v3, %v167_v8  ;;  %v821_v18 = vand.u32 4294901760, %v5427_v11  ;;  %v2031_v47 = vand.u32 4294901760, %v5490_v21  ;;  %v1366_v49 = vsel %vm53_vm0, %v1359_v22, 0 }
  0x3a   :  { %v194_v13 = vand.u32 4294901760, %v193_v9  ;;  %v201_v14 = vand.u32 4294901760, %v200_v10  ;;  %v5518_v53 = vand.u32 4294901760, %v1363_v30  ;;  %v1369_v54 = vsel %vm53_vm0, %v1360_v46, 0 }
  0x3b   :  { %v169_v23 = vand.u32 4294901760, %v168_v12  ;;  %v822_v27 = vsub.f32 %v5427_v11, %v821_v18  ;;  %v5541_v58 = vsub.f32 %v5490_v21, %v2031_v47  ;;  %v5549_v62 = vand.u32 4294901760, %v1369_v54 }
  0x3c   :  { %v5433_v26 = vpack.c.bf16 %v201_v14, %v194_v13  ;;  %v5547_v61 = vsub.f32 %v1363_v30, %v5518_v53  ;;  %v1372_v63 = vsel %vm53_vm0, %v1361_v56, 0 }
  0x3d   :  { %4277 = vmatmul.mubr.f32.gmra.mrb[2].mxu0 %v169_v23  ;;  %v823_v37 = vand.u32 4294901760, %v822_v27  ;;  %v2146_v7 = vand.u32 4294901760, %v5541_v58  ;;  %v5584_v12 = vsub.f32 %v1369_v54, %v5549_v62 }
  0x3e   :  { %4782 = vmatprep.subr.bf16.mxu0 %v5433_v26  ;;  %4830 = vmatprep.subr.bf16.mxu1 %v5433_v26 }
  0x3f   :  { %4784 = vmatpush3.bf16.msra.mxu0 %v5433_v26  ;;  %4832 = vmatpush3.bf16.msra.mxu1 %v5433_v26  ;;  %v1465_v46 = vand.u32 4294901760, %v5584_v12 }
  0x40   :  { %4361 = vmatmul.mubr.f32.gmra.mrb[2].mxu1 %v823_v37  ;;  %4287 = vmatprep.mubr.f32.mxu0 %v5308_v16 }
  0x41   :  { %4371 = vmatprep.mubr.f32.mxu1 %v5310_v17  ;;  %4786 = vmatprep.subr.bf16.mxu0 %v5440_v35 }
  0x42   :  { %4288 = vmatmul.mubr.f32.vlgmr.msra.gmra.mrb[0].mxu0 %v5319_v20  ;;  %4834 = vmatprep.subr.bf16.mxu1 %v5440_v35 }
  0x43   :  { %4788 = vmatpush3.bf16.msra.mxu0 %v5440_v35  ;;  %4290 = vmatprep.mubr.f32.mxu0 %v5348_v34 }
  0x44   :  { %4372 = vmatmul.mubr.f32.vlgmr.msra.gmra.mrb[0].mxu1 %v5342_v31  ;;  %4790 = vmatprep.subr.bf16.mxu0 %v5449_v38 }
  0x45   :  { %4836 = vmatpush3.bf16.msra.mxu1 %v5440_v35  ;;  %4374 = vmatprep.mubr.f32.mxu1 %v5370_v43 }
  0x46   :  { %4291 = vmatmul.mubr.f32.gmra.mrb[2].mxu0 %v5392_v60  ;;  %4838 = vmatprep.subr.bf16.mxu1 %v5449_v38 }
  0x47   :  { %4792 = vmatpush3.bf16.msra.mxu0 %v5449_v38  ;;  %4301 = vmatprep.mubr.f32.mxu0 %v5328_v24  ;;  %v2028_v24 = vand.u32 4294901760, %v5485_v44 }
  0x48   :  { %4375 = vmatmul.mubr.f32.gmra.mrb[2].mxu1 %v5416_v6  ;;  %4794 = vmatprep.subr.bf16.mxu0 %v5306_v15 }
  0x49   :  { %4840 = vmatpush3.bf16.msra.mxu1 %v5449_v38  ;;  %4385 = vmatprep.mubr.f32.mxu1 %v5331_v25  ;;  %v5514_v25 = vld [vmem:[#allocation2 + $0x30] sm:$0xff]  ;;  %v5533_v57 = vsub.f32 %v5485_v44, %v2028_v24  ;;  %v5588_v13 = vpack.c.bf16 %v2031_v47, %v2028_v24 }
  0x4a   :  { %4302 = vmatmul.mubr.f32.vlgmr.msra.gmra.mrb[0].mxu0 %v5338_v28  ;;  %4842 = vmatprep.subr.bf16.mxu1 %v5306_v15  ;;  %v2013_v28 = vld [vmem:[#allocation5 + $0x70] sm:$0xff] }
  0x4b   :  { %4796 = vmatpush3.bf16.msra.mxu0 %v5306_v15  ;;  %4304 = vmatprep.mubr.f32.mxu0 %v5368_v42  ;;  %v5529_v42 = vand.u32 4294901760, %v1366_v49 }
  0x4c   :  { %4386 = vmatmul.mubr.f32.vlgmr.msra.gmra.mrb[0].mxu1 %v5359_v39  ;;  %4798 = vmatprep.subr.bf16.mxu0 %v5317_v19  ;;  %v2034_v39 = vand.u32 4294901760, %v5514_v25 }
  0x4d   :  { %4844 = vmatpush3.bf16.msra.mxu1 %v5306_v15  ;;  %4388 = vmatprep.mubr.f32.mxu1 %v5380_v52  ;;  %v2022_v52 = vsel %vm53_vm0, %v2013_v28, 0  ;;  %v5563_v2 = vsub.f32 %v1366_v49, %v5529_v42 }
  0x4e   :  { %4305 = vmatmul.mubr.f32.gmra.mrb[2].mxu0 %v5412_v3  ;;  %4846 = vmatprep.subr.bf16.mxu1 %v5317_v19  ;;  %v2139_v3 = vand.u32 4294901760, %v5533_v57  ;;  %v5566_v4 = vand.u32 4294901760, %v2022_v52  ;;  %v5575_v9 = vsub.f32 %v5514_v25, %v2034_v39 }
  0x4f   :  { %4800 = vmatpush3.bf16.msra.mxu0 %v5317_v19  ;;  %4315 = vmatprep.mubr.f32.mxu0 %v137_v32  ;;  %v2016_v32 = vsel %vm53_vm0, %v2011_v45, 0  ;;  %v1455_v27 = vand.u32 4294901760, %v5563_v2  ;;  %v2147_v45 = vsub.f32 %v5541_v58, %v2146_v7 }
  0x50   :  { %4389 = vmatmul.mubr.f32.gmra.mrb[2].mxu1 %v5427_v11  ;;  %4802 = vmatprep.subr.bf16.mxu0 %v5479_v40  ;;  %v1445_v11 = vand.u32 4294901760, %v5547_v61  ;;  %v2140_v37 = vsub.f32 %v5533_v57, %v2139_v3  ;;  %v5603_v41 = vsub.f32 %v2022_v52, %v5566_v4  ;;  %v2153_v30 = vand.u32 4294901760, %v5575_v9 }
  0x51   :  { %4848 = vmatpush3.bf16.msra.mxu1 %v5317_v19  ;;  %4399 = vmatprep.mubr.f32.mxu1 %v791_v33  ;;  %v5516_v33 = vld [vmem:[#allocation2 + $0x38] sm:$0xff]  ;;  %v1456_v28 = vsub.f32 %v5563_v2, %v1455_v27 }
  0x52   :  { %4316 = vmatmul.mubr.f32.vlgmr.msra.gmra.mrb[0].mxu0 %v147_v36  ;;  %4850 = vmatprep.subr.bf16.mxu1 %v5479_v40  ;;  %v5523_v36 = vand.u32 4294901760, %v2016_v32  ;;  %v2141_v54 = vand.u32 4294901760, %v2140_v37  ;;  %v2118_v56 = vand.u32 4294901760, %v5603_v41 }
  0x53   :  { %4804 = vmatpush3.bf16.msra.mxu0 %v5479_v40  ;;  %4318 = vmatprep.mubr.f32.mxu0 %v157_v51  ;;  %v2019_v51 = vsel %vm53_vm0, %v2012_v50, 0 }
  0x54   :  { %4400 = vmatmul.mubr.f32.vlgmr.msra.gmra.mrb[0].mxu1 %v801_v48  ;;  %4806 = vmatprep.subr.bf16.mxu0 %v5498_v29  ;;  %v2037_v48 = vand.u32 4294901760, %v5516_v33  ;;  %v5556_v0 = vsub.f32 %v2016_v32, %v5523_v36  ;;  %v5558_v1 = vand.u32 4294901760, %v2019_v51  ;;  %v1446_v32 = vsub.f32 %v5547_v61, %v1445_v11 }
  0x55   :  { %4852 = vmatpush3.bf16.msra.mxu1 %v5479_v40  ;;  %4402 = vmatprep.mubr.f32.mxu1 %v811_v59  ;;  %v2014_v59 = vld [vmem:[#allocation5 + $0x78] sm:$0xff]  ;;  %v2119_v37 = vsub.f32 %v5603_v41, %v2118_v56 }
  0x56   :  { %4319 = vmatmul.mubr.f32.gmra.mrb[2].mxu0 %v167_v8  ;;  %4854 = vmatprep.subr.bf16.mxu1 %v5498_v29  ;;  %v2025_v5 = vsel %vm53_vm0, %v2014_v59, 0  ;;  %v5572_v8 = vand.u32 4294901760, %v1372_v63  ;;  %v5578_v10 = vsub.f32 %v5516_v33, %v2037_v48  ;;  %v5591_v14 = vsub.f32 %v2019_v51, %v5558_v1 }
  0x57   :  { %4808 = vmatpush3.bf16.msra.mxu0 %v5498_v29  ;;  %4329 = vmatprep.mubr.f32.mxu0 %v5308_v16  ;;  %v2098_v23 = vand.u32 4294901760, %v5556_v0  ;;  %v5623_v47 = vpack.c.bf16 %v2037_v48, %v2034_v39  ;;  %v2148_v51 = vand.u32 4294901760, %v2147_v45  ;;  %v1447_v52 = vand.u32 4294901760, %v1446_v32 }
  0x58   :  { %4403 = vmatmul.mubr.f32.gmra.mrb[2].mxu1 %v821_v18  ;;  %4810 = vmatprep.subr.bf16.mxu0 %v5306_v15  ;;  %v5593_v18 = vand.u32 4294901760, %v2025_v5  ;;  %v5611_v22 = vsub.f32 %v1372_v63, %v5572_v8  ;;  %v2160_v24 = vand.u32 4294901760, %v5578_v10  ;;  %v6033_v49 = vand.u32 4294901760, %v5591_v14 }
  0x59   :  { %4856 = vmatpush3.bf16.msra.mxu1 %v5498_v29  ;;  %4413 = vmatprep.mubr.f32.mxu1 %v5310_v17 }
  0x5a   :  { %4330 = vmatmul.mubr.f32.vlgmr.msra.gmra.mrb[0].mxu0 %v5319_v20  ;;  %4858 = vmatprep.subr.bf16.mxu1 %v5306_v15  ;;  %v5627_v50 = vsub.f32 %v2025_v5, %v5593_v18  ;;  %v1475_v39 = vand.u32 4294901760, %v5611_v22  ;;  %v2161_v48 = vsub.f32 %v5578_v10, %v2160_v24  ;;  %v2109_v59 = vsub.f32 %v5591_v14, %v6033_v49 }
  0x5b   :  { %4812 = vmatpush3.bf16.msra.mxu0 %v5306_v15  ;;  %4332 = vmatprep.mubr.f32.mxu0 %v5348_v34  ;;  %v1457_v5 = vand.u32 4294901760, %v1456_v28  ;;  %v2120_v28 = vand.u32 4294901760, %v2119_v37 }
  0x5c   :  { %4414 = vmatmul.mubr.f32.vlgmr.msra.gmra.mrb[0].mxu1 %v5342_v31  ;;  %4814 = vmatprep.subr.bf16.mxu0 %v5317_v19  ;;  %v2128_v63 = vand.u32 4294901760, %v5627_v50  ;;  %v1476_v45 = vsub.f32 %v5611_v22, %v1475_v39  ;;  %v2162_v49 = vand.u32 4294901760, %v2161_v48  ;;  %v5734_v48 = vld [vmem:[#allocation2 + $0x48] sm:$0xff] }
  0x5d   :  { %4860 = vmatpush3.bf16.msra.mxu1 %v5306_v15  ;;  %4416 = vmatprep.mubr.f32.mxu1 %v5370_v43 }
  0x5e   :  { %4333 = vmatmul.mubr.f32.gmra.mrb[2].mxu0 %v5392_v60  ;;  %4862 = vmatprep.subr.bf16.mxu1 %v5317_v19 }
  0x5f   :  { %4816 = vmatpush3.bf16.msra.mxu0 %v5317_v19  ;;  %4343 = vmatprep.mubr.f32.mxu0 %v5308_v16  ;;  %v2099_v16 = vsub.f32 %v5556_v0, %v2098_v23 }
  0x60   :  { %4417 = vmatmul.mubr.f32.gmra.mrb[2].mxu1 %v5416_v6  ;;  %4866 = vmatprep.subr.bf16.mxu0 %v5306_v15 }
  0x61   :  { %4864 = vmatpush3.bf16.msra.mxu1 %v5317_v19  ;;  %4427 = vmatprep.mubr.f32.mxu1 %v5310_v17  ;;  %v2154_v17 = vsub.f32 %v5575_v9, %v2153_v30 }
  0x62   :  { %4344 = vmatmul.mubr.f32.vlgmr.msra.gmra.mrb[0].mxu0 %v5319_v20  ;;  %4914 = vmatprep.subr.bf16.mxu1 %v5588_v13  ;;  %v1466_v20 = vsub.f32 %v5584_v12, %v1465_v46 }
  0x63   :  { %4868 = vmatpush3.bf16.msra.mxu0 %v5306_v15  ;;  %4346 = vmatprep.mubr.f32.mxu0 %v5348_v34  ;;  %v2100_v34 = vand.u32 4294901760, %v2099_v16  ;;  %v2155_v32 = vand.u32 4294901760, %v2154_v17  ;;  %v2110_v16 = vand.u32 4294901760, %v2109_v59  ;;  %v5686_v17 = vpack.c.bf16 %v5541_v58, %v5533_v57 }
  0x64   :  { %4428 = vmatmul.mubr.f32.vlgmr.msra.gmra.mrb[0].mxu1 %v5342_v31  ;;  %4870 = vmatprep.subr.bf16.mxu0 %v5317_v19  ;;  %v5665_v31 = vpack.c.bf16 %v2148_v51, %v2141_v54  ;;  %v1477_v54 = vand.u32 4294901760, %v1476_v45 }
  0x65   :  { %4916 = vmatpush3.bf16.msra.mxu1 %v5588_v13  ;;  %4430 = vmatprep.mubr.f32.mxu1 %v5370_v43  ;;  %v1467_v43 = vand.u32 4294901760, %v1466_v20  ;;  %v5678_v51 = vpack.c.bf16 %v2162_v49, %v2155_v32  ;;  %v3317_v49 = vld [vmem:[#allocation5 + $0xa0] sm:$0xff] }
  0x66   :  { %4347 = vmatmul.mubr.f32.gmra.mrb[2].mxu0 %v5392_v60  ;;  %4918 = vmatprep.subr.bf16.mxu1 %v5623_v47  ;;  %v2129_v60 = vsub.f32 %v5627_v50, %v2128_v63 }
  0x67   :  { %4872 = vmatpush3.bf16.msra.mxu0 %v5317_v19  ;;  %4441 = vmatprep.mubr.f32.mxu0 %v1447_v52  ;;  %v2665_v52 = vld [vmem:[#allocation5 + $0x88] sm:$0xff] }
  0x68   :  { %4431 = vmatmul.mubr.f32.gmra.mrb[2].mxu1 %v5416_v6  ;;  %4874 = vmatprep.subr.bf16.mxu0 %v5382_v55  ;;  %v2130_v6 = vand.u32 4294901760, %v2129_v60 }
  0x69   :  { %4920 = vmatpush3.bf16.msra.mxu1 %v5623_v47  ;;  %4525 = vmatprep.mubr.f32.mxu1 %v2100_v34 }
  0x6a   :  { %4442 = vmatmul.mubr.f32.vlgmr.msra.gmra.mrb[4].mxu0 %v1457_v5  ;;  %4922 = vmatprep.subr.bf16.mxu1 %v5665_v31 }
  0x6b   :  { %4876 = vmatpush3.bf16.msra.mxu0 %v5382_v55  ;;  %4444 = vmatprep.mubr.f32.mxu0 %v1467_v43  ;;  %v5697_v55 = vpack.c.bf16 %v5578_v10, %v5575_v9  ;;  %v3319_v9 = vld [vmem:[#allocation5 + $0xb0] sm:$0xff]  ;;  %v6039_v10 = vand.u32 4294901760, %v5591_v14 }
  0x6c   :  { %4526 = vmatmul.mubr.f32.vlgmr.msra.gmra.mrb[4].mxu1 %v2110_v16  ;;  %4878 = vmatprep.subr.bf16.mxu0 %v5433_v26 }
  0x6d   :  { %4924 = vmatpush3.bf16.msra.mxu1 %v5665_v31  ;;  %4528 = vmatprep.mubr.f32.mxu1 %v2120_v28 }
  0x6e   :  { %4445 = vmatmul.mubr.f32.gmra.mrb[6].mxu0 %v1477_v54  ;;  %4926 = vmatprep.subr.bf16.mxu1 %v5678_v51 }
  0x6f   :  { %4880 = vmatpush3.bf16.msra.mxu0 %v5433_v26  ;;  %4455 = vmatprep.mubr.f32.mxu0 %v5518_v53  ;;  %v2664_v26 = vld [vmem:[#allocation5 + $0x80] sm:$0xff] }
  0x70   :  { %4529 = vmatmul.mubr.f32.gmra.mrb[6].mxu1 %v2130_v6  ;;  %4882 = vmatprep.subr.bf16.mxu0 %v5440_v35  ;;  %v2669_v57 = vsel %vm53_vm0, %v2664_v26, 0 }
  0x71   :  { %4928 = vmatpush3.bf16.msra.mxu1 %v5678_v51  ;;  %4539 = vmatprep.mubr.f32.mxu1 %v5523_v36  ;;  %v5762_v20 = vand.u32 4294901760, %v2669_v57 }
  0x72   :  { %4456 = vmatmul.mubr.f32.vlgmr.msra.gmra.mrb[4].mxu0 %v5529_v42  ;;  %4930 = vmatprep.subr.bf16.mxu1 %v5686_v17 }
  0x73   :  { %4884 = vmatpush3.bf16.msra.mxu0 %v5440_v35  ;;  %4458 = vmatprep.mubr.f32.mxu0 %v5549_v62  ;;  %v5727_v35 = vpack.c.bf16 %v2146_v7, %v2139_v3  ;;  %v3322_v3 = vsel %vm53_vm0, %v3317_v49, 0  ;;  %v5751_v7 = vpack.c.bf16 %v2160_v24, %v2153_v30  ;;  %v5791_v37 = vsub.f32 %v2669_v57, %v5762_v20 }
  0x74   :  { %4540 = vmatmul.mubr.f32.vlgmr.msra.gmra.mrb[4].mxu1 %v5558_v1  ;;  %4886 = vmatprep.subr.bf16.mxu0 %v5449_v38  ;;  %v5767_v30 = vand.u32 4294901760, %v3322_v3 }
  0x75   :  { %4932 = vmatpush3.bf16.msra.mxu1 %v5686_v17  ;;  %4542 = vmatprep.mubr.f32.mxu1 %v5566_v4  ;;  %v2751_v6 = vand.u32 4294901760, %v5791_v37 }
  0x76   :  { %4459 = vmatmul.mubr.f32.gmra.mrb[6].mxu0 %v5572_v8  ;;  %4934 = vmatprep.subr.bf16.mxu1 %v5697_v55  ;;  %v5800_v45 = vsub.f32 %v3322_v3, %v5767_v30 }
  0x77   :  { %4888 = vmatpush3.bf16.msra.mxu0 %v5449_v38  ;;  %4469 = vmatprep.mubr.f32.mxu0 %v5547_v61  ;;  %v5729_v38 = vld [vmem:[#allocation2 + $0x40] sm:$0xff]  ;;  %v2666_v61 = vld [vmem:[#allocation5 + $0x90] sm:$0xff] }
  0x78   :  { %4543 = vmatmul.mubr.f32.gmra.mrb[6].mxu1 %v5593_v18  ;;  %4890 = vmatprep.subr.bf16.mxu0 %v5306_v15  ;;  %v3334_v58 = vand.u32 4294901760, %v5729_v38  ;;  %v2675_v24 = vsel %vm53_vm0, %v2666_v61, 0 }
  0x79   :  { %4936 = vmatpush3.bf16.msra.mxu1 %v5697_v55  ;;  %4553 = vmatprep.mubr.f32.mxu1 %v5556_v0  ;;  %v2672_v0 = vsel %vm53_vm0, %v2665_v52, 0 }
  0x7a   :  { %4470 = vmatmul.mubr.f32.vlgmr.msra.gmra.mrb[4].mxu0 %v5563_v2  ;;  %4938 = vmatprep.subr.bf16.mxu1 %v5588_v13  ;;  %v5758_v2 = vld [vmem:[#allocation2 + $0x50] sm:$0xff]  ;;  %v5777_v59 = vsub.f32 %v5729_v38, %v3334_v58 }
  0x7b   :  { %4892 = vmatpush3.bf16.msra.mxu0 %v5306_v15  ;;  %4472 = vmatprep.mubr.f32.mxu0 %v5584_v12  ;;  %v5773_v12 = vand.u32 4294901760, %v2672_v0 }
  0x7c   :  { %4554 = vmatmul.mubr.f32.vlgmr.msra.gmra.mrb[4].mxu1 %v5591_v14  ;;  %4894 = vmatprep.subr.bf16.mxu0 %v5317_v19  ;;  %v3340_v14 = vand.u32 4294901760, %v5758_v2  ;;  %v3445_v43 = vand.u32 4294901760, %v5777_v59 }
  0x7d   :  { %4940 = vmatpush3.bf16.msra.mxu1 %v5588_v13  ;;  %4556 = vmatprep.mubr.f32.mxu1 %v5603_v41  ;;  %v3328_v41 = vsel %vm53_vm0, %v3319_v9, 0 }
  0x7e   :  { %4473 = vmatmul.mubr.f32.gmra.mrb[6].mxu0 %v5611_v22  ;;  %4942 = vmatprep.subr.bf16.mxu1 %v5623_v47  ;;  %v5793_v22 = vand.u32 4294901760, %v2675_v24  ;;  %v5810_v16 = vand.u32 4294901760, %v3328_v41  ;;  %v5819_v28 = vsub.f32 %v5758_v2, %v3340_v14  ;;  %v3446_v61 = vsub.f32 %v5777_v59, %v3445_v43 }
  0x7f   :  { %4896 = vmatpush3.bf16.msra.mxu0 %v5317_v19  ;;  %4483 = vmatprep.mubr.f32.mxu0 %v1445_v11  ;;  %v3337_v11 = vand.u32 4294901760, %v5734_v48 }
  0x80   :  { %4557 = vmatmul.mubr.f32.gmra.mrb[6].mxu1 %v5627_v50  ;;  %4898 = vmatprep.subr.bf16.mxu0 %v5479_v40  ;;  %v5828_v26 = vsub.f32 %v2675_v24, %v5793_v22 }
  0x81   :  { %4944 = vmatpush3.bf16.msra.mxu1 %v5623_v47  ;;  %4567 = vmatprep.mubr.f32.mxu1 %v2098_v23  ;;  %v3318_v23 = vld [vmem:[#allocation5 + $0xa8] sm:$0xff]  ;;  %v5785_v5 = vsub.f32 %v5734_v48, %v3337_v11  ;;  %v5832_v49 = vpack.c.bf16 %v3337_v11, %v3334_v58  ;;  %v5847_v58 = vsub.f32 %v3328_v41, %v5810_v16 }
  0x82   :  { %4484 = vmatmul.mubr.f32.vlgmr.msra.gmra.mrb[4].mxu0 %v1455_v27  ;;  %4946 = vmatprep.subr.bf16.mxu1 %v5727_v35  ;;  %v5760_v27 = vld [vmem:[#allocation2 + $0x58] sm:$0xff]  ;;  %v6035_v24 = vand.u32 4294901760, %v5828_v26 }
  0x83   :  { %4900 = vmatpush3.bf16.msra.mxu0 %v5479_v40  ;;  %4486 = vmatprep.mubr.f32.mxu0 %v1465_v46  ;;  %v2667_v40 = vld [vmem:[#allocation5 + $0x98] sm:$0xff]  ;;  %v3325_v46 = vsel %vm53_vm0, %v3318_v23, 0  ;;  %v3343_v34 = vand.u32 4294901760, %v5760_v27  ;;  %v6034_v23 = vand.u32 4294901760, %v5819_v28 }
  0x84   :  { %4568 = vmatmul.mubr.f32.vlgmr.msra.gmra.mrb[4].mxu1 %v6039_v10  ;;  %4902 = vmatprep.subr.bf16.mxu0 %v5498_v29  ;;  %v5802_v32 = vand.u32 4294901760, %v3325_v46  ;;  %v2752_v10 = vsub.f32 %v5791_v37, %v2751_v6 }
  0x85   :  { %4948 = vmatpush3.bf16.msra.mxu1 %v5727_v35  ;;  %4570 = vmatprep.mubr.f32.mxu1 %v2118_v56  ;;  %v3320_v56 = vld [vmem:[#allocation5 + $0xb8] sm:$0xff]  ;;  %v5822_v54 = vsub.f32 %v5760_v27, %v3343_v34 }
  0x86   :  { %4487 = vmatmul.mubr.f32.gmra.mrb[6].mxu0 %v1475_v39  ;;  %4950 = vmatprep.subr.bf16.mxu1 %v5751_v7  ;;  %v2678_v39 = vsel %vm53_vm0, %v2667_v40, 0  ;;  %v3331_v50 = vsel %vm53_vm0, %v3320_v56, 0  ;;  %v5835_v52 = vsub.f32 %v3325_v46, %v5802_v32  ;;  %v5867_v40 = vpack.c.bf16 %v3343_v34, %v3340_v14 }
  0x87   :  { %4904 = vmatpush3.bf16.msra.mxu0 %v5498_v29  ;;  %4497 = vmatprep.mubr.f32.mxu0 %v5518_v53  ;;  %v5807_v29 = vsub.f32 %v2672_v0, %v5773_v12  ;;  %v5816_v60 = vand.u32 4294901760, %v2678_v39  ;;  %v5837_v57 = vand.u32 4294901760, %v3331_v50  ;;  %v6037_v9 = vand.u32 4294901760, %v5822_v54 }
  0x88   :  { %4571 = vmatmul.mubr.f32.gmra.mrb[6].mxu1 %v2128_v63  ;;  %4906 = vmatprep.subr.bf16.mxu0 %v5306_v15  ;;  %v3452_v63 = vand.u32 4294901760, %v5785_v5  ;;  %v6036_v46 = vand.u32 4294901760, %v5835_v52  ;;  %v3447_v56 = vand.u32 4294901760, %v3446_v61  ;;  %v3424_v14 = vand.u32 4294901760, %v5847_v58 }
  0x89   :  { %4952 = vmatpush3.bf16.msra.mxu1 %v5751_v7  ;;  %4581 = vmatprep.mubr.f32.mxu1 %v5523_v36  ;;  %v6038_v3 = vand.u32 4294901760, %v5807_v29  ;;  %v5855_v0 = vsub.f32 %v2678_v39, %v5816_v60  ;;  %v5871_v41 = vsub.f32 %v3331_v50, %v5837_v57  ;;  %v3467_v50 = vsub.f32 %v5822_v54, %v6037_v9 }
  0x8a   :  { %4498 = vmatmul.mubr.f32.vlgmr.msra.gmra.mrb[4].mxu0 %v5529_v42  ;;  %4954 = vmatprep.subr.bf16.mxu1 %v5588_v13  ;;  %v3453_v11 = vsub.f32 %v5785_v5, %v3452_v63  ;;  %v2753_v61 = vand.u32 4294901760, %v2752_v10 }
  0x8b   :  { %4908 = vmatpush3.bf16.msra.mxu0 %v5306_v15  ;;  %4500 = vmatprep.mubr.f32.mxu0 %v5549_v62  ;;  %v3404_v15 = vand.u32 4294901760, %v5800_v45  ;;  %v2781_v39 = vand.u32 4294901760, %v5855_v0 }
  0x8c   :  { %4582 = vmatmul.mubr.f32.vlgmr.msra.gmra.mrb[4].mxu1 %v5558_v1  ;;  %4910 = vmatprep.subr.bf16.mxu0 %v5317_v19  ;;  %v3454_v34 = vand.u32 4294901760, %v3453_v11  ;;  %v3415_v11 = vsub.f32 %v5835_v52, %v6036_v46 }
  0x8d   :  { %4956 = vmatpush3.bf16.msra.mxu1 %v5588_v13  ;;  %4584 = vmatprep.mubr.f32.mxu1 %v5566_v4  ;;  %v2782_v46 = vsub.f32 %v5855_v0, %v2781_v39 }
  0x8e   :  { %4501 = vmatmul.mubr.f32.gmra.mrb[6].mxu0 %v5572_v8  ;;  %4958 = vmatprep.subr.bf16.mxu1 %v5623_v47 }
  0x8f   :  { %4912 = vmatpush3.bf16.msra.mxu0 %v5317_v19  ;;  %4511 = vmatprep.mubr.f32.mxu0 %v5518_v53  ;;  %v3405_v19 = vsub.f32 %v5800_v45, %v3404_v15  ;;  %v2762_v53 = vsub.f32 %v5807_v29, %v6038_v3  ;;  %v3468_v3 = vand.u32 4294901760, %v3467_v50 }
  0x90   :  { %4585 = vmatmul.mubr.f32.gmra.mrb[6].mxu1 %v5593_v18  ;;  %4962 = vmatprep.subr.bf16.mxu0 %v5588_v13 }
  0x91   :  { %4960 = vmatpush3.bf16.msra.mxu1 %v5623_v47  ;;  %4595 = vmatprep.mubr.f32.mxu1 %v5523_v36  ;;  %v3460_v36 = vsub.f32 %v5819_v28, %v6034_v23  ;;  %v3434_v23 = vand.u32 4294901760, %v5871_v41  ;;  %v2763_v10 = vand.u32 4294901760, %v2762_v53 }
  0x92   :  { %4512 = vmatmul.mubr.f32.vlgmr.msra.gmra.mrb[4].mxu0 %v5529_v42  ;;  %5010 = vmatprep.subr.bf16.mxu1 %v5832_v49  ;;  %v2772_v42 = vsub.f32 %v5828_v26, %v6035_v24  ;;  %v3425_v24 = vsub.f32 %v5847_v58, %v3424_v14 }
  0x93   :  { %4964 = vmatpush3.bf16.msra.mxu0 %v5588_v13  ;;  %4514 = vmatprep.mubr.f32.mxu0 %v5549_v62  ;;  %v3406_v62 = vand.u32 4294901760, %v3405_v19  ;;  %v3461_v9 = vand.u32 4294901760, %v3460_v36  ;;  %v3416_v19 = vand.u32 4294901760, %v3415_v11  ;;  %v5025_v36 = vpack.c.bf16 %v5785_v5, %v5777_v59 }
  0x94   :  { %4596 = vmatmul.mubr.f32.vlgmr.msra.gmra.mrb[4].mxu1 %v5558_v1  ;;  %4966 = vmatprep.subr.bf16.mxu0 %v5623_v47  ;;  %v5017_v1 = vpack.c.bf16 %v3454_v34, %v3447_v56  ;;  %v3426_v53 = vand.u32 4294901760, %v3425_v24  ;;  %v2783_v56 = vand.u32 4294901760, %v2782_v46  ;;  %v6042_v59 = vand.u32 4294901760, %v5822_v54 }
  0x95   :  { %5012 = vmatpush3.bf16.msra.mxu1 %v5832_v49  ;;  %4598 = vmatprep.mubr.f32.mxu1 %v5566_v4  ;;  %v2773_v4 = vand.u32 4294901760, %v2772_v42  ;;  %v5021_v34 = vpack.c.bf16 %v3468_v3, %v3461_v9 }
  0x96   :  { %4515 = vmatmul.mubr.f32.gmra.mrb[6].mxu0 %v5572_v8  ;;  %5014 = vmatprep.subr.bf16.mxu1 %v5867_v40  ;;  %v3435_v8 = vsub.f32 %v5871_v41, %v3434_v23 }
  0x97   :  { %4968 = vmatpush3.bf16.msra.mxu0 %v5623_v47  ;;  %4609 = vmatprep.mubr.f32.mxu0 %v2753_v61 }
  0x98   :  { %4599 = vmatmul.mubr.f32.gmra.mrb[6].mxu1 %v5593_v18  ;;  %4970 = vmatprep.subr.bf16.mxu0 %v5665_v31  ;;  %v3436_v18 = vand.u32 4294901760, %v3435_v8 }
  0x99   :  { %5016 = vmatpush3.bf16.msra.mxu1 %v5867_v40  ;;  %4693 = vmatprep.mubr.f32.mxu1 %v3406_v62 }
  0x9a   :  { %4610 = vmatmul.mubr.f32.vlgmr.msra.gmra.mrb[8].mxu0 %v2763_v10  ;;  %5018 = vmatprep.subr.bf16.mxu1 %v5017_v1 }
  0x9b   :  { %4972 = vmatpush3.bf16.msra.mxu0 %v5665_v31  ;;  %4612 = vmatprep.mubr.f32.mxu0 %v2773_v4  ;;  %v5029_v31 = vpack.c.bf16 %v5822_v54, %v5819_v28 }
  0x9c   :  { %4694 = vmatmul.mubr.f32.vlgmr.msra.gmra.mrb[8].mxu1 %v3416_v19  ;;  %4974 = vmatprep.subr.bf16.mxu0 %v5678_v51 }
  0x9d   :  { %5020 = vmatpush3.bf16.msra.mxu1 %v5017_v1  ;;  %4696 = vmatprep.mubr.f32.mxu1 %v3426_v53  ;;  %v1355_v1 = vld [vmem:[#allocation2 + $0x70] sm:$0xff]  ;;  %v1356_v53 = vld [vmem:[#allocation2 + $0x78] sm:$0xff] }
  0x9e   :  { %4613 = vmatmul.mubr.f32.gmra.mrb[10].mxu0 %v2783_v56  ;;  %5022 = vmatprep.subr.bf16.mxu1 %v5021_v34 }
  0x9f   :  { %4976 = vmatpush3.bf16.msra.mxu0 %v5678_v51  ;;  %4623 = vmatprep.mubr.f32.mxu0 %v5762_v20  ;;  %v5041_v51 = vpack.c.bf16 %v3452_v63, %v3445_v43  ;;  %v6044_v43 = vand.u32 4294901760, %v5835_v52 }
  0xa0   :  { %4697 = vmatmul.mubr.f32.gmra.mrb[10].mxu1 %v3436_v18  ;;  %4978 = vmatprep.subr.bf16.mxu0 %v5686_v17 }
  0xa1   :  { %5024 = vmatpush3.bf16.msra.mxu1 %v5021_v34  ;;  %4707 = vmatprep.mubr.f32.mxu1 %v5767_v30 }
  0xa2   :  { %4624 = vmatmul.mubr.f32.vlgmr.msra.gmra.mrb[8].mxu0 %v5773_v12  ;;  %5026 = vmatprep.subr.bf16.mxu1 %v5025_v36 }
  0xa3   :  { %4980 = vmatpush3.bf16.msra.mxu0 %v5686_v17  ;;  %4626 = vmatprep.mubr.f32.mxu0 %v5793_v22  ;;  %v6040_v17 = vand.u32 4294901760, %v5807_v29 }
  0xa4   :  { %4708 = vmatmul.mubr.f32.vlgmr.msra.gmra.mrb[8].mxu1 %v5802_v32  ;;  %4982 = vmatprep.subr.bf16.mxu0 %v5697_v55 }
  0xa5   :  { %5028 = vmatpush3.bf16.msra.mxu1 %v5025_v36  ;;  %4710 = vmatprep.mubr.f32.mxu1 %v5810_v16 }
  0xa6   :  { %4627 = vmatmul.mubr.f32.gmra.mrb[10].mxu0 %v5816_v60  ;;  %5030 = vmatprep.subr.bf16.mxu1 %v5029_v31 }
  0xa7   :  { %4984 = vmatpush3.bf16.msra.mxu0 %v5697_v55  ;;  %4637 = vmatprep.mubr.f32.mxu0 %v5791_v37  ;;  %v6041_v55 = vand.u32 4294901760, %v5819_v28  ;;  %v6043_v37 = vand.u32 4294901760, %v5828_v26 }
  0xa8   :  { %4711 = vmatmul.mubr.f32.gmra.mrb[10].mxu1 %v5837_v57  ;;  %4986 = vmatprep.subr.bf16.mxu0 %v5588_v13 }
  0xa9   :  { %5032 = vmatpush3.bf16.msra.mxu1 %v5029_v31  ;;  %4721 = vmatprep.mubr.f32.mxu1 %v5800_v45  ;;  %v5045_v5 = vpack.c.bf16 %v6042_v59, %v6041_v55 }
  0xaa   :  { %4638 = vmatmul.mubr.f32.vlgmr.msra.gmra.mrb[8].mxu0 %v5807_v29  ;;  %5034 = vmatprep.subr.bf16.mxu1 %v5832_v49 }
  0xab   :  { %4988 = vmatpush3.bf16.msra.mxu0 %v5588_v13  ;;  %4640 = vmatprep.mubr.f32.mxu0 %v5828_v26 }
  0xac   :  { %4722 = vmatmul.mubr.f32.vlgmr.msra.gmra.mrb[8].mxu1 %v5835_v52  ;;  %4990 = vmatprep.subr.bf16.mxu0 %v5623_v47 }
  0xad   :  { %5036 = vmatpush3.bf16.msra.mxu1 %v5832_v49  ;;  %4724 = vmatprep.mubr.f32.mxu1 %v5847_v58 }
  0xae   :  { %4641 = vmatmul.mubr.f32.gmra.mrb[10].mxu0 %v5855_v0  ;;  %5038 = vmatprep.subr.bf16.mxu1 %v5867_v40 }
  0xaf   :  { %4992 = vmatpush3.bf16.msra.mxu0 %v5623_v47  ;;  %4651 = vmatprep.mubr.f32.mxu0 %v2751_v6 }
  0xb0   :  { %4725 = vmatmul.mubr.f32.gmra.mrb[10].mxu1 %v5871_v41  ;;  %4994 = vmatprep.subr.bf16.mxu0 %v5727_v35  ;;  %v1354_v41 = vld [vmem:[#allocation2 + $0x68] sm:$0xff] }
  0xb1   :  { %5040 = vmatpush3.bf16.msra.mxu1 %v5867_v40  ;;  %4735 = vmatprep.mubr.f32.mxu1 %v3404_v15 }
  0xb2   :  { %4652 = vmatmul.mubr.f32.vlgmr.msra.gmra.mrb[8].mxu0 %v6040_v17  ;;  %5042 = vmatprep.subr.bf16.mxu1 %v5041_v51 }
  0xb3   :  { %4996 = vmatpush3.bf16.msra.mxu0 %v5727_v35  ;;  %4654 = vmatprep.mubr.f32.mxu0 %v6043_v37 }
  0xb4   :  { %4736 = vmatmul.mubr.f32.vlgmr.msra.gmra.mrb[8].mxu1 %v6044_v43  ;;  %4998 = vmatprep.subr.bf16.mxu0 %v5751_v7 }
  0xb5   :  { %5044 = vmatpush3.bf16.msra.mxu1 %v5041_v51  ;;  %4738 = vmatprep.mubr.f32.mxu1 %v3424_v14  ;;  %v1353_v14 = vld [vmem:[#allocation2 + $0x60] sm:$0xff] }
  0xb6   :  { %4655 = vmatmul.mubr.f32.gmra.mrb[10].mxu0 %v2781_v39  ;;  %5046 = vmatprep.subr.bf16.mxu1 %v5045_v5 }
  0xb7   :  { %5000 = vmatpush3.bf16.msra.mxu0 %v5751_v7  ;;  %4665 = vmatprep.mubr.f32.mxu0 %v5762_v20 }
  0xb8   :  { %4739 = vmatmul.mubr.f32.gmra.mrb[10].mxu1 %v3434_v23  ;;  %5002 = vmatprep.subr.bf16.mxu0 %v5588_v13 }
  0xb9   :  { %5048 = vmatpush3.bf16.msra.mxu1 %v5045_v5  ;;  %4749 = vmatprep.mubr.f32.mxu1 %v5767_v30 }
  0xba   :  { %4666 = vmatmul.mubr.f32.vlgmr.msra.gmra.mrb[8].mxu0 %v5773_v12  ;;  %5050 = vmatprep.subr.bf16.mxu1 %v5832_v49 }
  0xbb   :  { %5004 = vmatpush3.bf16.msra.mxu0 %v5588_v13  ;;  %4668 = vmatprep.mubr.f32.mxu0 %v5793_v22 }
  0xbc   :  { %4750 = vmatmul.mubr.f32.vlgmr.msra.gmra.mrb[8].mxu1 %v5802_v32  ;;  %5006 = vmatprep.subr.bf16.mxu0 %v5623_v47 }
  0xbd   :  { %5052 = vmatpush3.bf16.msra.mxu1 %v5832_v49  ;;  %4752 = vmatprep.mubr.f32.mxu1 %v5810_v16 }
  0xbe   :  { %4669 = vmatmul.mubr.f32.gmra.mrb[10].mxu0 %v5816_v60  ;;  %5054 = vmatprep.subr.bf16.mxu1 %v5867_v40 }
  0xbf   :  { %5008 = vmatpush3.bf16.msra.mxu0 %v5623_v47  ;;  %4679 = vmatprep.mubr.f32.mxu0 %v5762_v20 }
  0xc0   :  { %4753 = vmatmul.mubr.f32.gmra.mrb[10].mxu1 %v5837_v57 }
  0xc1   :  { %5056 = vmatpush3.bf16.msra.mxu1 %v5867_v40  ;;  %4763 = vmatprep.mubr.f32.mxu1 %v5767_v30 }
  0xc2   :  { %4680 = vmatmul.mubr.f32.vlgmr.msra.gmra.mrb[8].mxu0 %v5773_v12 }
  0xc3   :  { %4682 = vmatprep.mubr.f32.mxu0 %v5793_v22 }
  0xc4   :  { %4764 = vmatmul.mubr.f32.vlgmr.msra.gmra.mrb[8].mxu1 %v5802_v32 }
  0xc5   :  { %4766 = vmatprep.mubr.f32.mxu1 %v5810_v16 }
  0xc6   :  { %4683 = vmatmul.mubr.f32.gmra.mrb[10].mxu0 %v5816_v60 }
  0xc8   :  { %4767 = vmatmul.mubr.f32.gmra.mrb[10].mxu1 %v5837_v57 }
 0x135   :  { %v4345_v13 = vpop.f32.mrb[0].mxu0 }
 0x136   :  { %v681_v47 = vmul.f32 %v4345_v13, %v5490_v21  ;;  %v658_v35 = vpop.f32.mrb[1].mxu0 }
 0x137   :  { %v4429_v7 = vpop.f32.mrb[0].mxu1  ;;  %v680_v20 = vmul.f32 %v5485_v44, %v658_v35 }
 0x138   :  { %v1335_v30 = vmul.f32 %v4429_v7, %v5734_v48  ;;  %v1312_v12 = vpop.f32.mrb[1].mxu1 }
 0x139   :  { %v684_v45 = vadd.f32 %v681_v47, %v680_v20  ;;  %v1334_v22 = vmul.f32 %v5729_v38, %v1312_v12  ;;  %v4348_v32 = vpop.f32.mrb[2].mxu0 }
 0x13a   :  { %v670_v29 = vpop.f32.mrb[3].mxu0  ;;  %v683_v54 = vmul.f32 %v4348_v32, %v5516_v33 }
 0x13b   :  { %v1338_v16 = vadd.f32 %v1335_v30, %v1334_v22  ;;  %v4432_v63 = vpop.f32.mrb[2].mxu1  ;;  %v682_v60 = vmul.f32 %v5514_v25, %v670_v29 }
 0x13c   :  { %v1324_v28 = vpop.f32.mrb[3].mxu1  ;;  %v1337_v44 = vmul.f32 %v4432_v63, %v5760_v27 }
 0x13d   :  { %v685_v21 = vadd.f32 %v684_v45, %v682_v60  ;;  %v1336_v6 = vmul.f32 %v5758_v2, %v1324_v28 }
 0x13f   :  { %v686_v26 = vadd.f32 %v685_v21, %v683_v54  ;;  %v1339_v49 = vadd.f32 %v1338_v16, %v1336_v6 }
 0x141   :  { %v687_v52 = vrot.slane %v686_v26, 4  ;;  %v1340_v57 = vadd.f32 %v1339_v49, %v1337_v44 }
 0x143   :  { %v688_v15 = vadd.f32 %v687_v52, %v686_v26  ;;  %v1341_v3 = vrot.slane %v1340_v57, 4 }
 0x145   :  { %v689_v58 = vrot.slane %v688_v15, 2  ;;  %v1342_v0 = vadd.f32 %v1341_v3, %v1340_v57 }
 0x147   :  { %v690_v23 = vadd.f32 %v689_v58, %v688_v15  ;;  %v1343_v9 = vrot.slane %v1342_v0, 2 }
 0x149   :  { %v691_v24 = vrot.slane %v690_v23, 1  ;;  %v1344_v25 = vadd.f32 %v1343_v9, %v1342_v0 }
 0x14b   :  { %v692_v40 = vadd.f32 %v691_v24, %v690_v23  ;;  %v1345_v46 = vrot.slane %v1344_v25, 1 }
 0x14d   :  { %693 = vst [vmem:[#allocation7] sm:$0x1] %v692_v40  ;;  %v1346_v33 = vadd.f32 %v1345_v46, %v1344_v25 }
 0x14f   :  { %1347 = vst [vmem:[#allocation7 + $0x1] sm:$0x1] %v1346_v33 }
 0x165   :  { %v4513_v39 = vpop.f32.mrb[4].mxu0 }
 0x166   :  { %v1989_v50 = vmul.f32 %v4513_v39, %v1354_v41  ;;  %v1966_v61 = vpop.f32.mrb[5].mxu0 }
 0x167   :  { %v4597_v42 = vpop.f32.mrb[4].mxu1  ;;  %v1988_v11 = vmul.f32 %v1966_v61, %v1353_v14 }
 0x168   :  { %v2642_v62 = vmul.f32 %v4597_v42, %v5734_v48  ;;  %v2619_v10 = vpop.f32.mrb[5].mxu1 }
 0x169   :  { %v1992_v4 = vadd.f32 %v1989_v50, %v1988_v11  ;;  %v2641_v19 = vmul.f32 %v5729_v38, %v2619_v10  ;;  %v4516_v8 = vpop.f32.mrb[6].mxu0 }
 0x16a   :  { %v1978_v56 = vpop.f32.mrb[7].mxu0  ;;  %v1991_v51 = vmul.f32 %v4516_v8, %v1356_v53 }
 0x16b   :  { %v2645_v34 = vadd.f32 %v2642_v62, %v2641_v19  ;;  %v4600_v18 = vpop.f32.mrb[6].mxu1  ;;  %v1990_v36 = vmul.f32 %v1978_v56, %v1355_v1 }
 0x16c   :  { %v2631_v31 = vpop.f32.mrb[7].mxu1  ;;  %v2644_v59 = vmul.f32 %v4600_v18, %v5760_v27 }
 0x16d   :  { %v1993_v17 = vadd.f32 %v1992_v4, %v1990_v36  ;;  %v2643_v55 = vmul.f32 %v5758_v2, %v2631_v31 }
 0x16f   :  { %v1994_v5 = vadd.f32 %v1993_v17, %v1991_v51  ;;  %v2646_v48 = vadd.f32 %v2645_v34, %v2643_v55 }
 0x171   :  { %v1995_v37 = vrot.slane %v1994_v5, 4  ;;  %v2647_v43 = vadd.f32 %v2646_v48, %v2644_v59 }
 0x173   :  { %v1996_v13 = vadd.f32 %v1995_v37, %v1994_v5  ;;  %v2648_v47 = vrot.slane %v2647_v43, 4 }
 0x175   :  { %v1997_v38 = vrot.slane %v1996_v13, 2  ;;  %v2649_v35 = vadd.f32 %v2648_v47, %v2647_v43 }
 0x177   :  { %v1998_v7 = vadd.f32 %v1997_v38, %v1996_v13  ;;  %v2650_v20 = vrot.slane %v2649_v35, 2 }
 0x179   :  { %v1999_v30 = vrot.slane %v1998_v7, 1  ;;  %v2651_v12 = vadd.f32 %v2650_v20, %v2649_v35 }
 0x17b   :  { %v2000_v45 = vadd.f32 %v1999_v30, %v1998_v7  ;;  %v2652_v22 = vrot.slane %v2651_v12, 1 }
 0x17d   :  { %2001 = vst [vmem:[#allocation7 + $0x2] sm:$0x1] %v2000_v45  ;;  %v2653_v32 = vadd.f32 %v2652_v22, %v2651_v12 }
 0x17f   :  { %2654 = vst [vmem:[#allocation7 + $0x3] sm:$0x1] %v2653_v32 }
 0x195   :  { %v4681_v2 = vpop.f32.mrb[8].mxu0 }
 0x196   :  { %v3295_v29 = vmul.f32 %v4681_v2, %v1354_v41  ;;  %v3272_v27 = vpop.f32.mrb[9].mxu0 }
 0x197   :  { %v4765_v16 = vpop.f32.mrb[8].mxu1  ;;  %v3294_v63 = vmul.f32 %v3272_v27, %v1353_v14 }
 0x198   :  { %v3948_v60 = vmul.f32 %v4765_v16, %v1354_v41  ;;  %v3925_v28 = vpop.f32.mrb[9].mxu1 }
 0x199   :  { %v3298_v54 = vadd.f32 %v3295_v29, %v3294_v63  ;;  %v3947_v21 = vmul.f32 %v3925_v28, %v1353_v14  ;;  %v4684_v6 = vpop.f32.mrb[10].mxu0 }
 0x19a   :  { %v3284_v44 = vpop.f32.mrb[11].mxu0  ;;  %v3297_v15 = vmul.f32 %v4684_v6, %v1356_v53 }
 0x19b   :  { %v3951_v26 = vadd.f32 %v3948_v60, %v3947_v21  ;;  %v4768_v49 = vpop.f32.mrb[10].mxu1  ;;  %v3296_v52 = vmul.f32 %v3284_v44, %v1355_v1 }
 0x19c   :  { %v3937_v57 = vpop.f32.mrb[11].mxu1  ;;  %v3950_v0 = vmul.f32 %v4768_v49, %v1356_v53 }
 0x19d   :  { %v3299_v3 = vadd.f32 %v3298_v54, %v3296_v52  ;;  %v3949_v58 = vmul.f32 %v3937_v57, %v1355_v1 }
 0x19f   :  { %v3300_v23 = vadd.f32 %v3299_v3, %v3297_v15  ;;  %v3952_v9 = vadd.f32 %v3951_v26, %v3949_v58 }
 0x1a1   :  { %v3301_v24 = vrot.slane %v3300_v23, 4  ;;  %v3953_v25 = vadd.f32 %v3952_v9, %v3950_v0 }
 0x1a3   :  { %v3302_v40 = vadd.f32 %v3301_v24, %v3300_v23  ;;  %v3954_v46 = vrot.slane %v3953_v25, 4 }
 0x1a5   :  { %v3303_v33 = vrot.slane %v3302_v40, 2  ;;  %v3955_v41 = vadd.f32 %v3954_v46, %v3953_v25 }
 0x1a7   :  { %v3304_v39 = vadd.f32 %v3303_v33, %v3302_v40  ;;  %v3956_v14 = vrot.slane %v3955_v41, 2 }
 0x1a9   :  { %v3305_v50 = vrot.slane %v3304_v39, 1  ;;  %v3957_v61 = vadd.f32 %v3956_v14, %v3955_v41 }
 0x1ab   :  { %v3306_v42 = vadd.f32 %v3305_v50, %v3304_v39  ;;  %v3958_v11 = vrot.slane %v3957_v61, 1 }
 0x1ad   :  { %3307 = vst [vmem:[#allocation7 + $0x4] sm:$0x1] %v3306_v42  ;;  %v3959_v62 = vadd.f32 %v3958_v11, %v3957_v61 }
 0x1af   :  { %3960 = vst [vmem:[#allocation7 + $0x5] sm:$0x1] %v3959_v62 }
 0x1b0   :  { %5237 = shalt.err (!%p5234_p6)
}
 0x1b1   :  { %s5238_s10 = scalar_lea.hbm %s6032_s2, 128 }
 0x1b2   :  { %p5239_p7 = scmp.ne.s32.totalorder %s6032_s2, %s5238_s10  ;;  %p5242_p8 = scmp.lt.u32.totalorder %s5238_s10, %s6032_s2 }
 0x1b4   :  { %p5244_p9 = pnand %p5242_p8, %p5239_p7 }
 0x1b6   :  { %5247 = shalt.err (!%p5244_p9)
}
 0x1b7   :  { %3970 = dma.vmem_to_hbm [thread:$0]  %s3968_s6, 128, %s6032_s2, [#allocation4]  }
 0x1b8   :  { %5252 = dma.done.wait [#allocation4], 128  }
 0x1b9   :  { %5253 = vsyncadd [#allocation4], 4294967168 }
 0x1ba   :  { %3974 = vsyncpa [#allocation3], 1 }
 0x1bb   :  { %3975 = vsyncpa [#allocation6], 1 }
 0x1bc   :  { %3976 = vsyncpa [#allocation4], 1 }

</bundles_post_ra>
